<compile_context>
chip_gen: v5e
topology: v5e:2x2
jax: 0.10.0
libtpu: 0.0.40
codegen_flags: <defaults>
</compile_context>

<pallas_src>
import jax
import jax.numpy as jnp
from jax.experimental import pallas as pl
from jax.experimental.pallas import tpu as pltpu

OBS_DIM = 16     # observation_space.shape[0]
ACT_DIM = 4      # action_space.shape[0]
HIDDEN = 32      # ac_kwargs['pi']['hidden_sizes'] == ac_kwargs['val']['hidden_sizes'] == (32, 32)

OUT_WIDTH = 128          # lane-dense packed output slab width
IDX_A = 0                # lanes [0, ACT_DIM)   : action
IDX_QV = ACT_DIM         # lane ACT_DIM         : Qv1
IDX_QJ = ACT_DIM + 1     # lane ACT_DIM + 1     : Qj1
IDX_LOGP = ACT_DIM + 2   # lane ACT_DIM + 2     : logp(a)


def _vmem():
    return pl.BlockSpec(memory_space=pltpu.MemorySpace.VMEM)


def _smem():
    return pl.BlockSpec(memory_space=pltpu.MemorySpace.SMEM)


# ----------------------------------------------------------------------------
# Fused kernel: obs standardization + actor MLP + both (packed) Q critics.
# ----------------------------------------------------------------------------
def fused_step_kernel(obs_ref, mean_ref, std_ref,
                      pw1, pb1, pw2, pb2, pw3, pb3,
                      qw1o, qw1a, qb1, qw2, qb2, qw3, qb3,
                      logp_ref, out_ref):
    f32 = jnp.float32

    # --- OnlineMeanStd standardization (stays in vregs) ---
    x = (obs_ref[...] - mean_ref[...]) / std_ref[...]

    # --- actor: obs_dim -> 32 -> 32 -> act_dim (tanh, tanh, identity) ---
    h1 = jnp.tanh(jnp.dot(x, pw1[...], preferred_element_type=f32) + pb1[...])
    h2 = jnp.tanh(jnp.dot(h1, pw2[...], preferred_element_type=f32) + pb2[...])
    mu = jnp.dot(h2, pw3[...], preferred_element_type=f32) + pb3[...]

    # --- critics (Qv1 & Qj1 packed along lanes). concat(obs_n, a) is done by
    #     splitting the first-layer matmul, so it never materializes. ---
    g1 = jnp.tanh(jnp.dot(x, qw1o[...], preferred_element_type=f32)
                  + jnp.dot(mu, qw1a[...], preferred_element_type=f32)
                  + qb1[...])
    g2 = jnp.tanh(jnp.dot(g1, qw2[...], preferred_element_type=f32) + qb2[...])
    q = jnp.dot(g2, qw3[...], preferred_element_type=f32) + qb3[...]   # (B, 2) = [qv, qj]

    # --- single lane-dense packed output slab (one output DMA) ---
    b = out_ref.shape[0]
    out_ref[...] = jnp.zeros_like(out_ref)
    out_ref[:, IDX_A:IDX_A + ACT_DIM] = mu
    out_ref[:, IDX_QV:IDX_QJ + 1] = q
    out_ref[:, IDX_LOGP:IDX_LOGP + 1] = jnp.full((b, 1), logp_ref[0, 0], f32)


# ----------------------------------------------------------------------------
# One-time host-side parameter packing (do NOT call per step).
# ----------------------------------------------------------------------------
def pack_step_params(mean, std, pi_params, qv_params, qj_params):
    pw1, pb1, pw2, pb2, pw3, pb3, log_std = pi_params
    wv1, bv1, wv2, bv2, wv3, bv3 = qv_params
    wj1, bj1, wj2, bj2, wj3, bj3 = qj_params

    # Fuse Qv1 / Qj1: layer-1 weights concatenated along the output (lane) dim,
    # then split along the input dim so concat(obs_n, a) is never needed.
    wq1 = jnp.concatenate([wv1, wj1], axis=1)            # (OBS+ACT, 2H)
    qw1o, qw1a = wq1[:OBS_DIM], wq1[OBS_DIM:]            # (OBS, 2H), (ACT, 2H)
    qb1 = jnp.concatenate([bv1, bj1], axis=1)            # (1, 2H)

    qw2 = jnp.zeros((2 * HIDDEN, 2 * HIDDEN), jnp.float32)
    qw2 = qw2.at[:HIDDEN, :HIDDEN].set(wv2).at[HIDDEN:, HIDDEN:].set(wj2)
    qb2 = jnp.concatenate([bv2, bj2], axis=1)            # (1, 2H)

    qw3 = jnp.zeros((2 * HIDDEN, 2), jnp.float32)
    qw3 = qw3.at[:HIDDEN, 0:1].set(wv3).at[HIDDEN:, 1:2].set(wj3)
    qb3 = jnp.concatenate([bv3, bj3], axis=1)            # (1, 2)

    # logp of the deterministic action under N(mu, exp(log_std)) is obs-independent.
    logp_const = jnp.sum(-log_std - 0.5 * jnp.log(2.0 * jnp.pi),
                         axis=-1, keepdims=True).astype(jnp.float32)  # (1, 1)

    return (mean, std, pw1, pb1, pw2, pb2, pw3, pb3,
            qw1o, qw1a, qb1, qw2, qb2, qw3, qb3, logp_const)


@jax.jit
def deter_actor_critic_step(obs, packed_params):
    batch = obs.shape[0]
    out = pl.pallas_call(
        fused_step_kernel,
        out_shape=jax.ShapeDtypeStruct((batch, OUT_WIDTH), jnp.float32),
        in_specs=[_vmem()] * 16 + [_smem()],
        out_specs=_vmem(),
    )(obs, *packed_params)
    a = out[:, IDX_A:IDX_A + ACT_DIM]
    qv = out[:, IDX_QV:IDX_QV + 1]
    qj = out[:, IDX_QJ:IDX_QJ + 1]
    logp = out[:, IDX_LOGP:IDX_LOGP + 1]
    return a, qv, qj, logp


# ----------------------------------------------------------------------------
# Deterministic parameter init (kaiming_uniform-style), no checkpoint loading.
# ----------------------------------------------------------------------------
def _linear_init(key, fan_in, fan_out):
    kw, kb = jax.random.split(key)
    bound_w = jnp.sqrt(6.0 / fan_in)
    bound_b = 1.0 / jnp.sqrt(fan_in)
    w = jax.random.uniform(kw, (fan_in, fan_out), jnp.float32, -bound_w, bound_w)
    b = jax.random.uniform(kb, (1, fan_out), jnp.float32, -bound_b, bound_b)
    return w, b


def make_mlp_params(key, sizes):
    params = []
    keys = jax.random.split(key, len(sizes) - 1)
    for k, fi, fo in zip(keys, sizes[:-1], sizes[1:]):
        params.extend(_linear_init(k, fi, fo))
    return tuple(params)


def _reference_step(obs, mean, std, pi_params, qv_params, qj_params):
    """Pure-JAX reference of the (unfused) forward, for correctness checking."""
    w1, b1, w2, b2, w3, b3, log_std = pi_params
    x = (obs - mean) / std
    h = jnp.tanh(x @ w1 + b1)
    h = jnp.tanh(h @ w2 + b2)
    mu = h @ w3 + b3
    logp = jnp.sum(-log_std - 0.5 * jnp.log(2.0 * jnp.pi), axis=-1, keepdims=True)
    xc = jnp.concatenate([x, mu], axis=-1)

    def q(p):
        qw1, qb1, qw2, qb2, qw3, qb3 = p
        g = jnp.tanh(xc @ qw1 + qb1)
        g = jnp.tanh(g @ qw2 + qb2)
        return g @ qw3 + qb3

    return mu, q(qv_params), q(qj_params), jnp.broadcast_to(logp, (obs.shape[0], 1))


if __name__ == "__main__":
    root = jax.random.PRNGKey(0)
    k_obs, k_pi, k_qv, k_qj = jax.random.split(root, 4)

    # single observation (torch step() is unbatched -> batch=1 here)
    obs = jax.random.normal(k_obs, (1, OBS_DIM), dtype=jnp.float32)

    # OnlineMeanStd at init: mean=0, std=1
    oms_mean = jnp.zeros((1, OBS_DIM), dtype=jnp.float32)
    oms_std = jnp.ones((1, OBS_DIM), dtype=jnp.float32)

    # pi: MLPGaussianActor  obs_dim -> 32 -> 32 -> act_dim, plus log_std param
    pi_mlp = make_mlp_params(k_pi, [OBS_DIM, HIDDEN, HIDDEN, ACT_DIM])
    log_std = jnp.full((1, ACT_DIM), -0.5, dtype=jnp.float32)
    pi_params = pi_mlp + (log_std,)

    # Qv1 / Qj1: QCritic  (obs_dim + act_dim) -> 32 -> 32 -> 1
    qv_params = make_mlp_params(k_qv, [OBS_DIM + ACT_DIM, HIDDEN, HIDDEN, 1])
    qj_params = make_mlp_params(k_qj, [OBS_DIM + ACT_DIM, HIDDEN, HIDDEN, 1])

    # one-time packing (critic fusion, logp constant)
    packed = pack_step_params(oms_mean, oms_std, pi_params, qv_params, qj_params)

    a, qv, qj, logp = deter_actor_critic_step(obs, packed)
    jax.block_until_ready((a, qv, qj, logp))

    assert a.shape == (1, ACT_DIM)
    assert qv.shape == (1, 1) and qj.shape == (1, 1) and logp.shape == (1, 1)

    # correctness check against the unfused pure-JAX reference
    a_r, qv_r, qj_r, logp_r = _reference_step(obs, oms_mean, oms_std,
                                              pi_params, qv_params, qj_params)
    assert jnp.allclose(a, a_r, atol=2e-4, rtol=2e-4)
    assert jnp.allclose(qv, qv_r, atol=2e-4, rtol=2e-4)
    assert jnp.allclose(qj, qj_r, atol=2e-4, rtol=2e-4)
    assert jnp.allclose(logp, logp_r, atol=2e-4, rtol=2e-4)

    print("KERNEL_OK")
</pallas_src>

<mosaic_0001>
module attributes {stable_mosaic.version = 11 : i64} {
  func.func @fused_step_kernel(%arg0: memref<1x16xf32, #tpu.memory_space<vmem>>, %arg1: memref<1x16xf32, #tpu.memory_space<vmem>>, %arg2: memref<1x16xf32, #tpu.memory_space<vmem>>, %arg3: memref<16x32xf32, #tpu.memory_space<vmem>>, %arg4: memref<1x32xf32, #tpu.memory_space<vmem>>, %arg5: memref<32x32xf32, #tpu.memory_space<vmem>>, %arg6: memref<1x32xf32, #tpu.memory_space<vmem>>, %arg7: memref<32x4xf32, #tpu.memory_space<vmem>>, %arg8: memref<1x4xf32, #tpu.memory_space<vmem>>, %arg9: memref<16x64xf32, #tpu.memory_space<vmem>>, %arg10: memref<4x64xf32, #tpu.memory_space<vmem>>, %arg11: memref<1x64xf32, #tpu.memory_space<vmem>>, %arg12: memref<64x64xf32, #tpu.memory_space<vmem>>, %arg13: memref<1x64xf32, #tpu.memory_space<vmem>>, %arg14: memref<64x2xf32, #tpu.memory_space<vmem>>, %arg15: memref<1x2xf32, #tpu.memory_space<vmem>>, %arg16: memref<1x1xf32, #tpu.memory_space<smem>>, %arg17: memref<1x128xf32, #tpu.memory_space<vmem>>) attributes {dimension_semantics = [], scalar_prefetch = 0 : i64, scratch_operands = 0 : i64, tpu.core_type = #tpu.core_type<tc>} {
    %c0 = arith.constant 0 : index
    %c0_0 = arith.constant 0 : index
    %0 = vector.load %arg0[%c0, %c0_0] : memref<1x16xf32, #tpu.memory_space<vmem>>, vector<1x16xf32>
    %c0_1 = arith.constant 0 : index
    %c0_2 = arith.constant 0 : index
    %1 = vector.load %arg1[%c0_1, %c0_2] : memref<1x16xf32, #tpu.memory_space<vmem>>, vector<1x16xf32>
    %2 = arith.subf %0, %1 : vector<1x16xf32>
    %c0_3 = arith.constant 0 : index
    %c0_4 = arith.constant 0 : index
    %3 = vector.load %arg2[%c0_3, %c0_4] : memref<1x16xf32, #tpu.memory_space<vmem>>, vector<1x16xf32>
    %4 = arith.divf %2, %3 : vector<1x16xf32>
    %c0_5 = arith.constant 0 : index
    %c0_6 = arith.constant 0 : index
    %5 = vector.load %arg3[%c0_5, %c0_6] : memref<16x32xf32, #tpu.memory_space<vmem>>, vector<16x32xf32>
    %cst = arith.constant dense<0.000000e+00> : vector<1x32xf32>
    %6 = tpu.matmul %4, %5, %cst {dimension_numbers = #tpu.dot_dimension_numbers<[1], [0], [0], [1], [0, 0, 1, 1], [], []>} : vector<1x16xf32>, vector<16x32xf32>, vector<1x32xf32> -> vector<1x32xf32>
    %c0_7 = arith.constant 0 : index
    %c0_8 = arith.constant 0 : index
    %7 = vector.load %arg4[%c0_7, %c0_8] : memref<1x32xf32, #tpu.memory_space<vmem>>, vector<1x32xf32>
    %8 = arith.addf %6, %7 : vector<1x32xf32>
    %9 = math.tanh %8 : vector<1x32xf32>
    %c0_9 = arith.constant 0 : index
    %c0_10 = arith.constant 0 : index
    %10 = vector.load %arg5[%c0_9, %c0_10] : memref<32x32xf32, #tpu.memory_space<vmem>>, vector<32x32xf32>
    %cst_11 = arith.constant dense<0.000000e+00> : vector<1x32xf32>
    %11 = tpu.matmul %9, %10, %cst_11 {dimension_numbers = #tpu.dot_dimension_numbers<[1], [0], [0], [1], [0, 0, 1, 1], [], []>} : vector<1x32xf32>, vector<32x32xf32>, vector<1x32xf32> -> vector<1x32xf32>
    %c0_12 = arith.constant 0 : index
    %c0_13 = arith.constant 0 : index
    %12 = vector.load %arg6[%c0_12, %c0_13] : memref<1x32xf32, #tpu.memory_space<vmem>>, vector<1x32xf32>
    %13 = arith.addf %11, %12 : vector<1x32xf32>
    %14 = math.tanh %13 : vector<1x32xf32>
    %c0_14 = arith.constant 0 : index
    %c0_15 = arith.constant 0 : index
    %15 = vector.load %arg7[%c0_14, %c0_15] : memref<32x4xf32, #tpu.memory_space<vmem>>, vector<32x4xf32>
    %cst_16 = arith.constant dense<0.000000e+00> : vector<1x4xf32>
    %16 = tpu.matmul %14, %15, %cst_16 {dimension_numbers = #tpu.dot_dimension_numbers<[1], [0], [0], [1], [0, 0, 1, 1], [], []>} : vector<1x32xf32>, vector<32x4xf32>, vector<1x4xf32> -> vector<1x4xf32>
    %c0_17 = arith.constant 0 : index
    %c0_18 = arith.constant 0 : index
    %17 = vector.load %arg8[%c0_17, %c0_18] : memref<1x4xf32, #tpu.memory_space<vmem>>, vector<1x4xf32>
    %18 = arith.addf %16, %17 : vector<1x4xf32>
    %c0_19 = arith.constant 0 : index
    %c0_20 = arith.constant 0 : index
    %19 = vector.load %arg9[%c0_19, %c0_20] : memref<16x64xf32, #tpu.memory_space<vmem>>, vector<16x64xf32>
    %cst_21 = arith.constant dense<0.000000e+00> : vector<1x64xf32>
    %20 = tpu.matmul %4, %19, %cst_21 {dimension_numbers = #tpu.dot_dimension_numbers<[1], [0], [0], [1], [0, 0, 1, 1], [], []>} : vector<1x16xf32>, vector<16x64xf32>, vector<1x64xf32> -> vector<1x64xf32>
    %c0_22 = arith.constant 0 : index
    %c0_23 = arith.constant 0 : index
    %21 = vector.load %arg10[%c0_22, %c0_23] : memref<4x64xf32, #tpu.memory_space<vmem>>, vector<4x64xf32>
    %cst_24 = arith.constant dense<0.000000e+00> : vector<1x64xf32>
    %22 = tpu.matmul %18, %21, %cst_24 {dimension_numbers = #tpu.dot_dimension_numbers<[1], [0], [0], [1], [0, 0, 1, 1], [], []>} : vector<1x4xf32>, vector<4x64xf32>, vector<1x64xf32> -> vector<1x64xf32>
    %23 = arith.addf %20, %22 : vector<1x64xf32>
    %c0_25 = arith.constant 0 : index
    %c0_26 = arith.constant 0 : index
    %24 = vector.load %arg11[%c0_25, %c0_26] : memref<1x64xf32, #tpu.memory_space<vmem>>, vector<1x64xf32>
    %25 = arith.addf %23, %24 : vector<1x64xf32>
    %26 = math.tanh %25 : vector<1x64xf32>
    %c0_27 = arith.constant 0 : index
    %c0_28 = arith.constant 0 : index
    %27 = vector.load %arg12[%c0_27, %c0_28] : memref<64x64xf32, #tpu.memory_space<vmem>>, vector<64x64xf32>
    %cst_29 = arith.constant dense<0.000000e+00> : vector<1x64xf32>
    %28 = tpu.matmul %26, %27, %cst_29 {dimension_numbers = #tpu.dot_dimension_numbers<[1], [0], [0], [1], [0, 0, 1, 1], [], []>} : vector<1x64xf32>, vector<64x64xf32>, vector<1x64xf32> -> vector<1x64xf32>
    %c0_30 = arith.constant 0 : index
    %c0_31 = arith.constant 0 : index
    %29 = vector.load %arg13[%c0_30, %c0_31] : memref<1x64xf32, #tpu.memory_space<vmem>>, vector<1x64xf32>
    %30 = arith.addf %28, %29 : vector<1x64xf32>
    %31 = math.tanh %30 : vector<1x64xf32>
    %c0_32 = arith.constant 0 : index
    %c0_33 = arith.constant 0 : index
    %32 = vector.load %arg14[%c0_32, %c0_33] : memref<64x2xf32, #tpu.memory_space<vmem>>, vector<64x2xf32>
    %cst_34 = arith.constant dense<0.000000e+00> : vector<1x2xf32>
    %33 = tpu.matmul %31, %32, %cst_34 {dimension_numbers = #tpu.dot_dimension_numbers<[1], [0], [0], [1], [0, 0, 1, 1], [], []>} : vector<1x64xf32>, vector<64x2xf32>, vector<1x2xf32> -> vector<1x2xf32>
    %c0_35 = arith.constant 0 : index
    %c0_36 = arith.constant 0 : index
    %34 = vector.load %arg15[%c0_35, %c0_36] : memref<1x2xf32, #tpu.memory_space<vmem>>, vector<1x2xf32>
    %35 = arith.addf %33, %34 : vector<1x2xf32>
    %cst_37 = arith.constant 0.000000e+00 : f32
    %36 = vector.broadcast %cst_37 : f32 to vector<1x128xf32>
    %c0_38 = arith.constant 0 : index
    %c0_39 = arith.constant 0 : index
    %37 = vector.load %arg17[%c0_38, %c0_39] : memref<1x128xf32, #tpu.memory_space<vmem>>, vector<1x128xf32>
    tpu.vector_store %arg17[%c0_38, %c0_39], %36 {strides = array<i32>} : memref<1x128xf32, #tpu.memory_space<vmem>>, vector<1x128xf32>,
    %c0_40 = arith.constant 0 : index
    %c0_41 = arith.constant 0 : index
    %38 = vector.load %arg17[%c0_40, %c0_41] : memref<1x128xf32, #tpu.memory_space<vmem>>, vector<1x4xf32>
    tpu.vector_store %arg17[%c0_40, %c0_41], %18 {strides = array<i32>} : memref<1x128xf32, #tpu.memory_space<vmem>>, vector<1x4xf32>,
    %c0_42 = arith.constant 0 : index
    %c4 = arith.constant 4 : index
    %39 = vector.load %arg17[%c0_42, %c4] : memref<1x128xf32, #tpu.memory_space<vmem>>, vector<1x2xf32>
    tpu.vector_store %arg17[%c0_42, %c4], %35 {strides = array<i32>} : memref<1x128xf32, #tpu.memory_space<vmem>>, vector<1x2xf32>,
    %c0_43 = arith.constant 0 : index
    %c0_44 = arith.constant 0 : index
    %40 = memref.load %arg16[%c0_43, %c0_44] : memref<1x1xf32, #tpu.memory_space<smem>>
    %41 = vector.broadcast %40 : f32 to vector<1x1xf32>
    %c0_45 = arith.constant 0 : index
    %c6 = arith.constant 6 : index
    %42 = vector.load %arg17[%c0_45, %c6] : memref<1x128xf32, #tpu.memory_space<vmem>>, vector<1x1xf32>
    tpu.vector_store %arg17[%c0_45, %c6], %41 {strides = array<i32>} : memref<1x128xf32, #tpu.memory_space<vmem>>, vector<1x1xf32>,
    return
  }
}

</mosaic_0001>

<bundles_post_ra>
// kernel: deter_actor_critic_step.1
= control target key start
LH: loop header
LB: loop body
LE: loop exit
PB: predicated region body
PF: predicated region fallthrough
CT: control target
= control target key end

     0   :  { %s716_s0 = inlined_call_operand.vmem [shape: f32[1,16], index: 0, kind: input, shape index: {}]   ;;  %s717_s1 = inlined_call_operand.vmem [shape: f32[1,16], index: 1, kind: input, shape index: {}]   ;;  %s718_s2 = inlined_call_operand.vmem [shape: f32[1,16], index: 2, kind: input, shape index: {}]   ;;  %s719_s3 = inlined_call_operand.hbm [shape: f32[16,32], index: 3, kind: input, shape index: {}]   ;;  %s720_s4 = inlined_call_operand.hbm [shape: f32[1,32], index: 4, kind: input, shape index: {}]   ;;  %s721_s5 = inlined_call_operand.vmem [shape: f32[32,32], index: 5, kind: input, shape index: {}]   ;;  %s722_s6 = inlined_call_operand.hbm [shape: f32[1,32], index: 6, kind: input, shape index: {}]   ;;  %s723_s7 = inlined_call_operand.vmem [shape: f32[32,4], index: 7, kind: input, shape index: {}]   ;;  %s724_s8 = inlined_call_operand.vmem [shape: f32[1,4], index: 8, kind: input, shape index: {}]   ;;  %s725_s9 = inlined_call_operand.hbm [shape: f32[16,64], index: 9, kind: input, shape index: {}]   ;;  %s726_s10 = inlined_call_operand.vmem [shape: f32[4,64], index: 10, kind: input, shape index: {}]   ;;  %s727_s11 = inlined_call_operand.vmem [shape: f32[1,64], index: 11, kind: input, shape index: {}]   ;;  %s728_s12 = inlined_call_operand.vmem [shape: f32[64,64], index: 12, kind: input, shape index: {}]   ;;  %s729_s13 = inlined_call_operand.vmem [shape: f32[1,64], index: 13, kind: input, shape index: {}]   ;;  %s730_s14 = inlined_call_operand.vmem [shape: f32[64,2], index: 14, kind: input, shape index: {}]   ;;  %s731_s15 = inlined_call_operand.vmem [shape: f32[1,2], index: 15, kind: input, shape index: {}]   ;;  %s732_s16 = inlined_call_operand.<no memory space> [shape: f32[1,1], index: 16, kind: input, shape index: {}]   ;;  %s733_s17 = inlined_call_operand.vmem [shape: f32[1,128], index: 17, kind: output, shape index: {}]  }
   0x1   :  { %734 = sst [smem:[#allocation13_spill]] %s716_s0 }
   0x2   :  { %735 = sst [smem:[#allocation14_spill]] %s717_s1 }
   0x3   :  { %23 = vsyncpa [#allocation4], 0 }
   0x4   :  { %24 = vsyncpa [#allocation6], 0  ;;  %s50_s26 = sshll.u32 %s720_s4, 4  ;;  %s51_s26 = int_to_ptr.hbm [resolvable:$true] %s50_s26 }
   0x5   :  { %25 = vsyncpa [#allocation9], 0  ;;  %s489_s27 = smov [#allocation5]   ;;  %s36_s30 = sshll.u32 %s719_s3, 4  ;;  %s37_s30 = int_to_ptr.hbm [resolvable:$true] %s36_s30 }
   0x6   :  { %s52_s28 = sshll.u32 %s489_s27, 4  ;;  %s490_s18 = smov [#allocation3]   ;;  %s53_s28 = int_to_ptr.vmem [resolvable:$true] %s52_s28 }
   0x7   :  { %55 = dma.hbm_to_vmem [thread:$0]  %s51_s26, 16, %s53_s28, [#allocation6]  }
   0x8   :  { %s38_s19 = sshll.u32 %s490_s18, 4  ;;  %s491_s1 = smov 128   ;;  %s39_s19 = int_to_ptr.vmem [resolvable:$true] %s38_s19 }
   0x9   :  { %s492_s20 = smov 8   ;;  %s63_s4 = sshll.u32 %s722_s6, 4  ;;  %s64_s4 = int_to_ptr.hbm [resolvable:$true] %s63_s4 }
   0xa   :  { %44 = dma.hbm_to_vmem [thread:$0]  %s37_s30, 256, %s39_s19, [#allocation4], %s491_s1, %s491_s1, %s492_s20  }
   0xb   :  { %s493_s23 = smov [#allocation7]   ;;  %s77_s3 = sshll.u32 %s725_s9, 4  ;;  %s78_s3 = int_to_ptr.hbm [resolvable:$true] %s77_s3 }
   0xc   :  { %s65_s24 = sshll.u32 %s493_s23, 4  ;;  %s494_s26 = smov [#allocation8]   ;;  %s66_s24 = int_to_ptr.vmem [resolvable:$true] %s65_s24 }
   0xd   :  { %68 = dma.hbm_to_vmem [thread:$0]  %s64_s4, 16, %s66_s24, [#allocation6]  }
   0xe   :  { %s79_s28 = sshll.u32 %s494_s26, 4  ;;  %s80_s28 = int_to_ptr.vmem [resolvable:$true] %s79_s28 }
   0xf   :  { %85 = dma.hbm_to_vmem [thread:$0]  %s78_s3, 256, %s80_s28, [#allocation9], %s491_s1, %s491_s1, %s492_s20  }
  0x10   :  { %483 = dma.done.wait [#allocation4], 256  }
  0x11   :  { %484 = vsyncadd [#allocation4], 4294967040 }
  0x12   :  { %485 = dma.done.wait [#allocation6], 32  }
  0x13   :  { %486 = vsyncadd [#allocation6], 4294967264 }
  0x14   :  { %487 = dma.done.wait [#allocation9], 256  }
  0x15   :  { %488 = vsyncadd [#allocation9], 4294967040  ;;  %v136_v0 = vld [vmem:[#allocation3 + $0x8] sm:$0xff]  ;;  %v135_v1 = vld [vmem:[#allocation3] sm:$0xff]  ;;  %s736_s30 = sld [smem:[#allocation13_spill]]  ;;  %vm138_vm4 = vcmask 130048  }
  0x16   :  { %156 = vmatpush.msra.mxu0 %v136_v0  ;;  %v119_v2 = vld [vmem:[%s718_s2] sm:$0x1]  ;;  %s737_s1 = sld [smem:[#allocation14_spill]]  ;;  %v166_v17 = vld [vmem:[%s721_s5 + $0x18] sm:$0xff]  ;;  %v165_v18 = vld [vmem:[%s721_s5 + $0x10] sm:$0xff]  ;;  %vm168_vm5 = vcmask 261120  }
  0x17   :  { %377 = vrcp.f32 %v119_v2  ;;  %v131_v5 = vand.u32 2147483648, %v119_v2  ;;  %vm125_vm0 = vweird.f32 %v119_v2  ;;  %v129_v7 = vand.u32 2147483647, %v119_v2  ;;  %184 = vmatpush.msra.mxu2 %v166_v17  ;;  %v164_v19 = vld [vmem:[%s721_s5 + $0x8] sm:$0xff]  ;;  %v163_v20 = vld [vmem:[%s721_s5] sm:$0xff]  ;;  %v196_v25 = vld [vmem:[%s723_s7 + $0x18] sm:$0xff] }
  0x18   :  { %157 = vmatpush.msra.mxu0 %v135_v1  ;;  %v137_v21 = vld [vmem:[#allocation5] sm:$0x1]  ;;  %v194_v27 = vld [vmem:[%s723_s7 + $0x8] sm:$0xff]  ;;  %v193_v28 = vld [vmem:[%s723_s7] sm:$0xff]  ;;  %vm228_vm6 = vcmask 1043456   ;;  %v495_v34 = vmov 0.0  }
  0x19   :  { %v132_v11 = vor.u32 1.1754944e-38, %v131_v5  ;;  %vm130_vm3 = vcmp.eq.f32.partialorder %v129_v7, 8.507059e+37  ;;  %185 = vmatpush.msra.mxu2 %v165_v18  ;;  %v195_v26 = vld [vmem:[%s723_s7 + $0x10] sm:$0xff]  ;;  %v223_v33 = vld [vmem:[%s726_s10] sm:$0xf]  ;;  %341 = vst [vmem:[%s733_s17] sm:$0x1] %v495_v34  ;;  %v351_v5 = vstv %s732_s16 }
  0x1a   :  { %v167_v29 = vld [vmem:[#allocation7] sm:$0x1]  ;;  %364 = vmatpush.msk.msra.mxu3 %vm228_vm6, %v223_v33  ;;  %v222_v35 = vld [vmem:[#allocation8 + $0x8] sm:$0xff]  ;;  %v221_v36 = vld [vmem:[#allocation8] sm:$0xff]  ;;  %vm224_vm7 = vcmask 31744   ;;  %vm342_vm8 = vcmask 24576  }
  0x1b   :  { %v116_v8 = vld [vmem:[%s736_s30] sm:$0x1]  ;;  %186 = vmatpush.msra.mxu2 %v164_v19  ;;  %v282_v40 = vld [vmem:[%s728_s12 + $0x38] sm:$0xff]  ;;  %v281_v41 = vld [vmem:[%s728_s12 + $0x30] sm:$0xff]  ;;  %vm284_vm9 = vcmask 523264   ;;  %s496_s5 = smov 4  }
  0x1c   :  { %v117_v9 = vld [vmem:[%s737_s1] sm:$0x1]  ;;  %266 = vmatpush.msrb.mxu3 %v222_v35  ;;  %296 = vmatpush.msrb.mxu0 %v282_v40  ;;  %v280_v42 = vld [vmem:[%s728_s12 + $0x28] sm:$0xff]  ;;  %v278_v44 = vld [vmem:[%s728_s12 + $0x18] sm:$0xff]  ;;  %vm348_vm10 = vcmask 40992   ;;  %vm352_vm11 = vcmask 49200  }
  0x1d   :  { %v378_v3 = vpop.eup %377  ;;  %v118_v12 = vsub.f32 %v116_v8, %v117_v9  ;;  %187 = vmatpush.msra.mxu2 %v163_v20  ;;  %v197_v37 = vld [vmem:[%s724_s8] sm:$0x1]  ;;  %v277_v45 = vld [vmem:[%s728_s12 + $0x10] sm:$0xff]  ;;  %v276_v46 = vld [vmem:[%s728_s12 + $0x8] sm:$0xff] }
  0x1e   :  { %v121_v4 = vmul.f32 %v378_v3, %v119_v2  ;;  %vm126_vm1 = vweird.f32 %v378_v3  ;;  %267 = vmatpush.msrb.mxu3 %v221_v36  ;;  %297 = vmatpush.msrb.mxu0 %v281_v41  ;;  %v279_v43 = vld [vmem:[%s728_s12 + $0x20] sm:$0xff]  ;;  %v316_v48 = vld [vmem:[%s730_s14 + $0x38] sm:$0xff]  ;;  %v315_v49 = vld [vmem:[%s730_s14 + $0x30] sm:$0xff] }
  0x1f   :  { %vm127_vm2 = vmor %vm125_vm0, %vm126_vm1  ;;  %213 = vmatpush.msrb.mxu2 %v196_v25  ;;  %v275_v47 = vld [vmem:[%s728_s12] sm:$0xff]  ;;  %329 = vmatpush.msra.mxu1 %v316_v48  ;;  %v314_v50 = vld [vmem:[%s730_s14 + $0x28] sm:$0xff] }
  0x20   :  { %v122_v6 = vsub.f32 1.0, %v121_v4  ;;  %298 = vmatpush.msrb.mxu0 %v280_v42  ;;  %v272_v53 = vld [vmem:[%s727_s11] sm:$0x1]  ;;  %v312_v58 = vld [vmem:[%s730_s14 + $0x18] sm:$0xff]  ;;  %v311_v59 = vld [vmem:[%s730_s14 + $0x10] sm:$0xff] }
  0x21   :  { %214 = vmatpush.msrb.mxu2 %v195_v26  ;;  %330 = vmatpush.msra.mxu1 %v315_v49  ;;  %v313_v57 = vld [vmem:[%s730_s14 + $0x20] sm:$0xff]  ;;  %v310_v60 = vld [vmem:[%s730_s14 + $0x8] sm:$0xff] }
  0x22   :  { %v123_v10 = vmul.f32 %v378_v3, %v122_v6  ;;  %299 = vmatpush.msrb.mxu0 %v279_v43  ;;  %v309_v61 = vld [vmem:[%s730_s14] sm:$0xff] }
  0x23   :  { %215 = vmatpush.msrb.mxu2 %v194_v27  ;;  %331 = vmatpush.msra.mxu1 %v314_v50  ;;  %v283_v62 = vld [vmem:[%s729_s13] sm:$0x1] }
  0x24   :  { %v124_v13 = vadd.f32 %v378_v3, %v123_v10  ;;  %300 = vmatpush.msrb.mxu0 %v278_v44  ;;  %v317_v2 = vld [vmem:[%s731_s15] sm:$0x1] }
  0x25   :  { %216 = vmatpush.msrb.mxu2 %v193_v28  ;;  %332 = vmatpush.msra.mxu1 %v313_v57 }
  0x26   :  { %v128_v14 = vsel %vm127_vm2, %v378_v3, %v124_v13  ;;  %301 = vmatpush.msrb.mxu0 %v277_v45 }
  0x27   :  { %v133_v15 = vsel %vm130_vm3, %v132_v11, %v128_v14  ;;  %333 = vmatpush.msra.mxu1 %v312_v58 }
  0x28   :  { %v134_v16 = vmul.f32 %v133_v15, %v118_v12  ;;  %302 = vmatpush.msrb.mxu0 %v276_v46 }
  0x29   :  { %334 = vmatpush.msra.mxu1 %v311_v59 }
  0x2a   :  { %361 = vmatmul.msk.f32.vlgmr.msra.gmra.mxu0 %vm138_vm4, %v134_v16 }
  0x2b   :  { %303 = vmatpush.msrb.mxu0 %v275_v47  ;;  %335 = vmatpush.msra.mxu1 %v310_v60 }
  0x2d   :  { %336 = vmatpush.msra.mxu1 %v309_v61 }
  0xa7   :  { %v159_v22 = vpop.f32.mrf.mxu0 }
  0xa8   :  { %v160_v23 = vadd.f32 %v159_v22, %v137_v21 }
  0xaa   :  { %379 = vtanh.f32 %v160_v23 }
  0xb0   :  { %v380_v24 = vpop.eup %379 }
  0xb1   :  { %362 = vmatmul.msk.f32.vlgmr.msra.gmra.mxu2 %vm168_vm5, %v380_v24 }
 0x134   :  { %v189_v30 = vpop.f32.mrf.mxu2 }
 0x135   :  { %v190_v31 = vadd.f32 %v189_v30, %v167_v29 }
 0x137   :  { %381 = vtanh.f32 %v190_v31 }
 0x13d   :  { %v382_v32 = vpop.eup %381 }
 0x13e   :  { %363 = vmatmul.msk.f32.vlgmr.msrb.gmra.mxu2 %vm168_vm5, %v382_v32 }
 0x1c1   :  { %v218_v38 = vpop.f32.mrf.mxu2 }
 0x1c2   :  { %v219_v39 = vadd.f32 %v218_v38, %v197_v37 }
 0x1c4   :  { %365 = vmatmul.msk.f32.vlgmr.msra.gmra.mxu3 %vm224_vm7, %v219_v39  ;;  %343 = vst.msk [vmem:[%s733_s17] sm:$0x1] %vm342_vm8, %v219_v39 }
 0x1cc   :  { %366 = vmatmul.msk.f32.vlgmr.msrb.gmra.mxu3 %vm138_vm4, %v134_v16 }
 0x247   :  { %v249_v51 = vpop.f32.mrf.mxu3 }
 0x24f   :  { %v269_v52 = vpop.f32.mrf.mxu3 }
 0x250   :  { %v270_v54 = vadd.f32 %v269_v52, %v249_v51 }
 0x252   :  { %v273_v55 = vadd.f32 %v272_v53, %v270_v54 }
 0x254   :  { %383 = vtanh.f32 %v273_v55 }
 0x25a   :  { %v384_v56 = vpop.eup %383 }
 0x25b   :  { %367 = vmatmul.msk.f32.vlgmr.msrb.gmra.mxu0 %vm284_vm9, %v384_v56 }
 0x2d8   :  { %v305_v63 = vpop.f32.mrf.mxu0 }
 0x2d9   :  { %v306_v0 = vadd.f32 %v305_v63, %v283_v62 }
 0x2db   :  { %385 = vtanh.f32 %v306_v0 }
 0x2e1   :  { %v386_v1 = vpop.eup %385 }
 0x2e2   :  { %368 = vmatmul.msk.f32.vlgmr.msra.gmra.mxu1 %vm284_vm9, %v386_v1 }
 0x35f   :  { %v338_v3 = vpop.f32.mrf.mxu1 }
 0x360   :  { %v339_v4 = vadd.f32 %v338_v3, %v317_v2 }
 0x362   :  { %345 = vrot.lane.b32.xlu0 %v339_v4, %s496_s5 }
 0x3d4   :  { %v346_v6 = vpop.permute.xlu0 %345 }
 0x3d5   :  { %349 = vst.msk [vmem:[%s733_s17] sm:$0x1] %vm348_vm10, %v346_v6 }
 0x3d6   :  { %353 = vst.msk [vmem:[%s733_s17] sm:$0x1] %vm352_vm11, %v351_v5 }
 0x3d7   :  { %358 = vsyncpa [#allocation4], 1 }
 0x3d8   :  { %359 = vsyncpa [#allocation6], 1 }
 0x3d9   :  { %360 = vsyncpa [#allocation9], 1 }

</bundles_post_ra>
